<compile_context>
chip_gen: v7x
topology: tpu7x:2x2x1
jax: 0.10.0
libtpu: 0.0.40
codegen_flags: <defaults>
</compile_context>

<pallas_src>
import functools

import jax
import jax.numpy as jnp
from jax.experimental import pallas as pl
from jax.experimental.pallas import tpu as pltpu

# ----------------------------- configuration -------------------------------
NUM_PATHS = 2
NUM_STAGES = 2
VERTICAL_CONNECT_STAGE0 = False   # fused kernel implements the False branch
C_IN = 4
PATH_CHANNELS = [8, 16]           # channels of path 0 / path 1
TM = 256                          # row tile: 2 blocks for M=512 -> megacore-friendly

# Set to jnp.bfloat16 on v6e/v7x for native-MXU operands (f32 accumulation is
# kept either way).  Left at f32 so numerics match the PyTorch/JAX reference
# exactly and the v5e store/epilogue path stays f32.
MATMUL_DTYPE = jnp.float32


def _dot(a, b):
    if MATMUL_DTYPE != jnp.float32:
        a = a.astype(MATMUL_DTYPE)
        b = b.astype(MATMUL_DTYPE)
    return jnp.dot(a, b, preferred_element_type=jnp.float32)


# ------------------------------ Pallas kernel -------------------------------
def _fused_backbone_kernel(*refs, num_stages):
    """Whole multi-path backbone for one row tile, all intermediates on-chip.

    refs = (x, w_s0, b_s0, [w_fus_s, b_fus_s, w_path_s, b_path_s]*(num_stages-1), out)
    """
    x_ref = refs[0]
    w_s0_ref, b_s0_ref = refs[1], refs[2]
    o_ref = refs[-1]
    stage_refs = refs[3:-1]

    # stage 0: both path blocks as one wide matmul + bias + ReLU
    h = jnp.maximum(_dot(x_ref[...], w_s0_ref[...]) + b_s0_ref[...], 0.0)

    # stages 1..num_stages-1: fusion (block weight) then per-path block (block-diag weight)
    for s in range(num_stages - 1):
        w_f_ref, b_f_ref, w_p_ref, b_p_ref = stage_refs[4 * s: 4 * s + 4]
        f = _dot(h, w_f_ref[...]) + b_f_ref[...]
        h = jnp.maximum(_dot(f, w_p_ref[...]) + b_p_ref[...], 0.0)

    # single lane-dense store of both paths' outputs, concatenated on channels
    o_ref[...] = h.astype(o_ref.dtype)


def fused_backbone_call(rows, packed):
    """rows: (M, C_IN) with M % TM == 0; packed: list of packed weight/bias arrays."""
    M, c_in = rows.shape
    c_total = packed[0].shape[1]
    const_map = lambda i: (0, 0)
    in_specs = [pl.BlockSpec((TM, c_in), lambda i: (i, 0))]
    in_specs += [pl.BlockSpec(p.shape, const_map) for p in packed]
    return pl.pallas_call(
        functools.partial(_fused_backbone_kernel, num_stages=NUM_STAGES),
        out_shape=jax.ShapeDtypeStruct((M, c_total), jnp.float32),
        grid_spec=pltpu.PrefetchScalarGridSpec(
            num_scalar_prefetch=0,
            grid=(M // TM,),
            in_specs=in_specs,
            out_specs=pl.BlockSpec((TM, c_total), lambda i: (i, 0)),
        ),
        compiler_params=pltpu.CompilerParams(
            dimension_semantics=("parallel",)),   # lets v7x shard row blocks over 2 TCs
    )(rows, *packed)


# ------------------------------ parameters ----------------------------------
def _init_linear(key, c_in, c_out):
    kw, kb = jax.random.split(key)
    scale = 1.0 / jnp.sqrt(jnp.float32(c_in))
    w = jax.random.normal(kw, (c_in, c_out), jnp.float32) * scale
    b = jax.random.normal(kb, (1, c_out), jnp.float32) * 0.1
    return {"w": w, "b": b}


def make_params(key):
    params = {}
    keys = iter(jax.random.split(key, 64))
    # stage 0 paths
    for p in range(NUM_PATHS):
        c_in = C_IN if (not VERTICAL_CONNECT_STAGE0 or p == 0) else PATH_CHANNELS[p - 1]
        params[f"path{p}_s0"] = _init_linear(next(keys), c_in, PATH_CHANNELS[p])
    # stages >= 1: fusion (all paths -> path p) + path block
    for s in range(1, NUM_STAGES):
        fus = {}
        for p in range(NUM_PATHS):
            fus[f"to{p}"] = {
                "w0": jax.random.normal(next(keys), (PATH_CHANNELS[0], PATH_CHANNELS[p]),
                                        jnp.float32) / jnp.sqrt(jnp.float32(PATH_CHANNELS[0])),
                "w1": jax.random.normal(next(keys), (PATH_CHANNELS[1], PATH_CHANNELS[p]),
                                        jnp.float32) / jnp.sqrt(jnp.float32(PATH_CHANNELS[1])),
                "b": jax.random.normal(next(keys), (1, PATH_CHANNELS[p]), jnp.float32) * 0.1,
            }
        params[f"fusions_s{s}"] = fus
        for p in range(NUM_PATHS):
            params[f"path{p}_s{s}"] = _init_linear(next(keys), PATH_CHANNELS[p], PATH_CHANNELS[p])
    return params


def pack_params(params):
    """Fold the per-path / per-target weights into the concatenated / block forms
    consumed by the fused kernel (trace-time only; equivalent to pre-packing)."""
    assert NUM_PATHS == 2, "packing below is written for the 2-path instantiation"
    assert not VERTICAL_CONNECT_STAGE0
    # TODO(synk): vertical_connect_stage0=True would chain per-path stage-0 dots
    # (different packing); not instantiated here.
    c0, c1 = PATH_CHANNELS

    w_s0 = jnp.concatenate([params["path0_s0"]["w"], params["path1_s0"]["w"]], axis=1)  # (C_IN, c0+c1)
    b_s0 = jnp.concatenate([params["path0_s0"]["b"], params["path1_s0"]["b"]], axis=1)  # (1, c0+c1)
    packed = [w_s0, b_s0]

    for s in range(1, NUM_STAGES):
        fus = params[f"fusions_s{s}"]
        # fusion block weight: rows = source path channels, cols = target path channels
        top = jnp.concatenate([fus["to0"]["w0"], fus["to1"]["w0"]], axis=1)   # (c0, c0+c1)
        bot = jnp.concatenate([fus["to0"]["w1"], fus["to1"]["w1"]], axis=1)   # (c1, c0+c1)
        w_fus = jnp.concatenate([top, bot], axis=0)                           # (c0+c1, c0+c1)
        b_fus = jnp.concatenate([fus["to0"]["b"], fus["to1"]["b"]], axis=1)
        # per-path stage blocks -> block-diagonal weight
        wp0 = params[f"path0_s{s}"]["w"]
        wp1 = params[f"path1_s{s}"]["w"]
        w_path = jnp.block([[wp0, jnp.zeros((c0, c1), jnp.float32)],
                            [jnp.zeros((c1, c0), jnp.float32), wp1]])         # (c0+c1, c0+c1)
        b_path = jnp.concatenate([params[f"path0_s{s}"]["b"],
                                  params[f"path1_s{s}"]["b"]], axis=1)
        packed += [w_fus, b_fus, w_path, b_path]
    return packed


# ------------------------------ forward pass ---------------------------------
@jax.jit
def multi_io_forward(x_nchw, params):
    n, c, h, w = x_nchw.shape
    rows = jnp.transpose(x_nchw, (0, 2, 3, 1)).reshape(n * h * w, c)
    m = rows.shape[0]
    m_pad = pl.cdiv(m, TM) * TM
    if m_pad != m:                      # general-shape robustness: pad row dim
        rows = jnp.pad(rows, ((0, m_pad - m), (0, 0)))

    packed = pack_params(params)
    out = fused_backbone_call(rows, packed)[:m]     # (M, c0+c1), lane-dense store

    c0 = PATH_CHANNELS[0]
    per_path = [out[:, :c0], out[:, c0:]]
    # header is None -> return list of per-path outputs, back in NCHW
    return [jnp.transpose(o.reshape(n, h, w, -1), (0, 3, 1, 2)) for o in per_path]


# pure-JAX reference (mirrors the PyTorch forward on the original params)
def multi_io_reference(x_nchw, params):
    n, c, h, w = x_nchw.shape
    rows = jnp.transpose(x_nchw, (0, 2, 3, 1)).reshape(n * h * w, c)

    def lin(x, pr, relu):
        y = x @ pr["w"] + pr["b"]
        return jnp.maximum(y, 0.0) if relu else y

    outputs = []
    inp = rows
    for p in range(NUM_PATHS):
        out = lin(inp, params[f"path{p}_s0"], True)
        outputs.append(out)
        if VERTICAL_CONNECT_STAGE0:
            inp = out
    for s in range(1, NUM_STAGES):
        fus = params[f"fusions_s{s}"]
        fused = [
            outputs[0] @ fus[f"to{p}"]["w0"] + outputs[1] @ fus[f"to{p}"]["w1"] + fus[f"to{p}"]["b"]
            for p in range(NUM_PATHS)
        ]
        outputs = [lin(fused[p], params[f"path{p}_s{s}"], True) for p in range(NUM_PATHS)]
    return [jnp.transpose(o.reshape(n, h, w, -1), (0, 3, 1, 2)) for o in outputs]


# --------------------------------- main --------------------------------------
if __name__ == "__main__":
    key = jax.random.PRNGKey(0)
    k_x, k_p = jax.random.split(key)
    x = jax.random.normal(k_x, (2, C_IN, 16, 16), jnp.float32)  # NCHW like PyTorch
    params = make_params(k_p)

    outs = multi_io_forward(x, params)
    outs = jax.block_until_ready(outs)

    refs = multi_io_reference(x, params)
    for o, r in zip(outs, refs):
        assert o.shape == r.shape
        assert jnp.max(jnp.abs(o - r)) < 1e-4

    print("KERNEL_OK")
</pallas_src>

<mosaic_0001>
module attributes {stable_mosaic.version = 11 : i64} {
  func.func @_fused_backbone_kernel(%arg0: i32, %arg1: memref<256x4xf32, #tpu.memory_space<vmem>>, %arg2: memref<4x24xf32, #tpu.memory_space<vmem>>, %arg3: memref<1x24xf32, #tpu.memory_space<vmem>>, %arg4: memref<24x24xf32, #tpu.memory_space<vmem>>, %arg5: memref<1x24xf32, #tpu.memory_space<vmem>>, %arg6: memref<24x24xf32, #tpu.memory_space<vmem>>, %arg7: memref<1x24xf32, #tpu.memory_space<vmem>>, %arg8: memref<256x24xf32, #tpu.memory_space<vmem>>) attributes {dimension_semantics = [#tpu.dimension_semantics<parallel>], iteration_bounds = array<i64: 2>, scalar_prefetch = 0 : i64, scratch_operands = 0 : i64, tpu.core_type = #tpu.core_type<tc>, window_params = [{transform_indices = @transform_0, window_bounds = array<i64: 256, 4>}, {pipeline_mode = #tpu.pipeline_mode<synchronous>, transform_indices = @transform_1, window_bounds = array<i64: 4, 24>}, {pipeline_mode = #tpu.pipeline_mode<synchronous>, transform_indices = @transform_2, window_bounds = array<i64: 1, 24>}, {pipeline_mode = #tpu.pipeline_mode<synchronous>, transform_indices = @transform_3, window_bounds = array<i64: 24, 24>}, {pipeline_mode = #tpu.pipeline_mode<synchronous>, transform_indices = @transform_4, window_bounds = array<i64: 1, 24>}, {pipeline_mode = #tpu.pipeline_mode<synchronous>, transform_indices = @transform_5, window_bounds = array<i64: 24, 24>}, {pipeline_mode = #tpu.pipeline_mode<synchronous>, transform_indices = @transform_6, window_bounds = array<i64: 1, 24>}, {transform_indices = @transform_7, window_bounds = array<i64: 256, 24>}]} {
    %c0 = arith.constant 0 : index
    %c0_0 = arith.constant 0 : index
    %0 = vector.load %arg1[%c0, %c0_0] : memref<256x4xf32, #tpu.memory_space<vmem>>, vector<256x4xf32>
    %c0_1 = arith.constant 0 : index
    %c0_2 = arith.constant 0 : index
    %1 = vector.load %arg2[%c0_1, %c0_2] : memref<4x24xf32, #tpu.memory_space<vmem>>, vector<4x24xf32>
    %cst = arith.constant dense<0.000000e+00> : vector<256x24xf32>
    %2 = tpu.matmul %0, %1, %cst {dimension_numbers = #tpu.dot_dimension_numbers<[1], [0], [0], [1], [0, 0, 1, 1], [], []>} : vector<256x4xf32>, vector<4x24xf32>, vector<256x24xf32> -> vector<256x24xf32>
    %c0_3 = arith.constant 0 : index
    %c0_4 = arith.constant 0 : index
    %3 = vector.load %arg3[%c0_3, %c0_4] : memref<1x24xf32, #tpu.memory_space<vmem>>, vector<1x24xf32>
    %4 = vector.broadcast %3 : vector<1x24xf32> to vector<256x24xf32>
    %5 = arith.addf %2, %4 : vector<256x24xf32>
    %cst_5 = arith.constant 0.000000e+00 : f32
    %6 = vector.broadcast %cst_5 : f32 to vector<256x24xf32>
    %7 = arith.maximumf %5, %6 : vector<256x24xf32>
    %c0_6 = arith.constant 0 : index
    %c0_7 = arith.constant 0 : index
    %8 = vector.load %arg4[%c0_6, %c0_7] : memref<24x24xf32, #tpu.memory_space<vmem>>, vector<24x24xf32>
    %cst_8 = arith.constant dense<0.000000e+00> : vector<256x24xf32>
    %9 = tpu.matmul %7, %8, %cst_8 {dimension_numbers = #tpu.dot_dimension_numbers<[1], [0], [0], [1], [0, 0, 1, 1], [], []>} : vector<256x24xf32>, vector<24x24xf32>, vector<256x24xf32> -> vector<256x24xf32>
    %c0_9 = arith.constant 0 : index
    %c0_10 = arith.constant 0 : index
    %10 = vector.load %arg5[%c0_9, %c0_10] : memref<1x24xf32, #tpu.memory_space<vmem>>, vector<1x24xf32>
    %11 = vector.broadcast %10 : vector<1x24xf32> to vector<256x24xf32>
    %12 = arith.addf %9, %11 : vector<256x24xf32>
    %c0_11 = arith.constant 0 : index
    %c0_12 = arith.constant 0 : index
    %13 = vector.load %arg6[%c0_11, %c0_12] : memref<24x24xf32, #tpu.memory_space<vmem>>, vector<24x24xf32>
    %cst_13 = arith.constant dense<0.000000e+00> : vector<256x24xf32>
    %14 = tpu.matmul %12, %13, %cst_13 {dimension_numbers = #tpu.dot_dimension_numbers<[1], [0], [0], [1], [0, 0, 1, 1], [], []>} : vector<256x24xf32>, vector<24x24xf32>, vector<256x24xf32> -> vector<256x24xf32>
    %c0_14 = arith.constant 0 : index
    %c0_15 = arith.constant 0 : index
    %15 = vector.load %arg7[%c0_14, %c0_15] : memref<1x24xf32, #tpu.memory_space<vmem>>, vector<1x24xf32>
    %16 = vector.broadcast %15 : vector<1x24xf32> to vector<256x24xf32>
    %17 = arith.addf %14, %16 : vector<256x24xf32>
    %cst_16 = arith.constant 0.000000e+00 : f32
    %18 = vector.broadcast %cst_16 : f32 to vector<256x24xf32>
    %19 = arith.maximumf %17, %18 : vector<256x24xf32>
    %c0_17 = arith.constant 0 : index
    %c0_18 = arith.constant 0 : index
    %20 = vector.load %arg8[%c0_17, %c0_18] : memref<256x24xf32, #tpu.memory_space<vmem>>, vector<256x24xf32>
    tpu.vector_store %arg8[%c0_17, %c0_18], %19 {strides = array<i32>} : memref<256x24xf32, #tpu.memory_space<vmem>>, vector<256x24xf32>,
    return
  }
  func.func @transform_0(%arg0: i32) -> (i32, i32) {
    %c0_i32 = arith.constant 0 : i32
    %c0_i32_0 = arith.constant 0 : i32
    return %arg0, %c0_i32 : i32, i32
  }
  func.func @transform_1(%arg0: i32) -> (i32, i32) {
    %c0_i32 = arith.constant 0 : i32
    %c0_i32_0 = arith.constant 0 : i32
    %c0_i32_1 = arith.constant 0 : i32
    return %c0_i32, %c0_i32_0 : i32, i32
  }
  func.func @transform_2(%arg0: i32) -> (i32, i32) {
    %c0_i32 = arith.constant 0 : i32
    %c0_i32_0 = arith.constant 0 : i32
    %c0_i32_1 = arith.constant 0 : i32
    return %c0_i32, %c0_i32_0 : i32, i32
  }
  func.func @transform_3(%arg0: i32) -> (i32, i32) {
    %c0_i32 = arith.constant 0 : i32
    %c0_i32_0 = arith.constant 0 : i32
    %c0_i32_1 = arith.constant 0 : i32
    return %c0_i32, %c0_i32_0 : i32, i32
  }
  func.func @transform_4(%arg0: i32) -> (i32, i32) {
    %c0_i32 = arith.constant 0 : i32
    %c0_i32_0 = arith.constant 0 : i32
    %c0_i32_1 = arith.constant 0 : i32
    return %c0_i32, %c0_i32_0 : i32, i32
  }
  func.func @transform_5(%arg0: i32) -> (i32, i32) {
    %c0_i32 = arith.constant 0 : i32
    %c0_i32_0 = arith.constant 0 : i32
    %c0_i32_1 = arith.constant 0 : i32
    return %c0_i32, %c0_i32_0 : i32, i32
  }
  func.func @transform_6(%arg0: i32) -> (i32, i32) {
    %c0_i32 = arith.constant 0 : i32
    %c0_i32_0 = arith.constant 0 : i32
    %c0_i32_1 = arith.constant 0 : i32
    return %c0_i32, %c0_i32_0 : i32, i32
  }
  func.func @transform_7(%arg0: i32) -> (i32, i32) {
    %c0_i32 = arith.constant 0 : i32
    %c0_i32_0 = arith.constant 0 : i32
    return %arg0, %c0_i32 : i32, i32
  }
}

</mosaic_0001>

<bundles_post_ra>
// kernel: multi_io_forward.1
= control target key start
LH: loop header
LB: loop body
LE: loop exit
PB: predicated region body
PF: predicated region fallthrough
CT: control target
= control target key end

     0   :  { %s1901_s24 = smov 0   ;;  %s2262_s0 = inlined_call_operand.vmem [shape: f32[512,4], index: 0, kind: input, shape index: {}]   ;;  %s2263_s1 = inlined_call_operand.vmem [shape: f32[4,24], index: 1, kind: input, shape index: {}]   ;;  %s2264_s2 = inlined_call_operand.vmem [shape: f32[1,24], index: 2, kind: input, shape index: {}]   ;;  %s2265_s3 = inlined_call_operand.vmem [shape: f32[24,24], index: 3, kind: input, shape index: {}]   ;;  %s2266_s4 = inlined_call_operand.vmem [shape: f32[1,24], index: 4, kind: input, shape index: {}]   ;;  %s2267_s5 = inlined_call_operand.vmem [shape: f32[24,24], index: 5, kind: input, shape index: {}]   ;;  %s2268_s6 = inlined_call_operand.vmem [shape: f32[1,24], index: 6, kind: input, shape index: {}]   ;;  %s2269_s7 = inlined_call_operand.vmem [shape: f32[512,24], index: 7, kind: output, shape index: {}]  }
   0x1 LB: > { %s1463_s25 = sadd.s32 4294967295, %s1859_s24   ;;  %p1467_p0 = scmp.ge.s32.totalorder %s1859_s24, 1  ;;  %s1859_s24 = sphi %s1901_s24, %s17_s24  }
   0x2   : > { %p238_p1 = scmp.lt.s32.totalorder %s1859_s24, 3 }
   0x4   : > { %p239_p2 = pnand %p1467_p0, %p238_p1 }
   0x5   : > { %v314_v0 = vld [vmem:[%s2263_s1] sm:$0xf] (!%p239_p2)  ;;  %vm419_vm0 = vcmask (!%p239_p2), 1043456   ;;  %s1468_s28 = sshll.u32 (!%p239_p2), %s1463_s25, 5  ;;  %v681_v2 = vld [vmem:[%s2265_s3 + $0x8] sm:$0xff] (!%p239_p2)  ;;  %vm322_vm1 = vcmask (!%p239_p2), 31744  }
   0x6   : > { %242 = sbr.rel (%p239_p2) target bundleno = 730 (0x2da), region = 48  ;;  %v680_v1 = vld [vmem:[%s2265_s3] sm:$0xff] (!%p239_p2)  ;;  %1677 = vmatprep.subr.msk.mxu0 (!%p239_p2), %vm419_vm0, %v314_v0  ;;  %p271_p3 = scmp.lt.s32.totalorder (!%p239_p2), %s1468_s28, 63  ;;  %1843 = vmatprep.subr.msk.mxu1 (!%p239_p2), %vm419_vm0, %v314_v0  ;;  %v682_v12 = vld [vmem:[%s2265_s3 + $0x10] sm:$0xff] (!%p239_p2)  ;;  %v1013_v38 = vld [vmem:[%s2267_s5 + $0x8] sm:$0xff] (!%p239_p2)  ;;  %vm690_vm2 = vcmask (!%p239_p2), 195584  }
   0x7   : > { %1678 = vmatpush3.msk.msra.mxu0 (!%p239_p2), %vm419_vm0, %v314_v0  ;;  %1844 = vmatpush3.msk.msra.mxu1 (!%p239_p2), %vm419_vm0, %v314_v0  ;;  %v1835_v3 = vpack.c.bf16 (!%p239_p2), %v681_v2, %v680_v1  ;;  %v1012_v37 = vld [vmem:[%s2267_s5] sm:$0xff] (!%p239_p2)  ;;  %v1014_v40 = vld [vmem:[%s2267_s5 + $0x10] sm:$0xff] (!%p239_p2) }
   0x8   : > { %v1839_v39 = vpack.c.bf16 (!%p239_p2), %v1013_v38, %v1012_v37  ;;  %v2007_v41 = vld [vmem:[%s2264_s2] ss:$0 sm:$0xff] (!%p239_p2) }
   0x9   : > { %1836 = vmatprep.subr.bf16.mxu1 (!%p239_p2), %v1835_v3 }
   0xa   : > { %1840 = vmatprep.subr.bf16.mxu0 (!%p239_p2), %v1839_v39 }
   0xd   : > { %s2271_s28 = smov (!%p271_p3, %s1468_s28), 63 }
   0xe   : > { %s1469_s10 = sshll.u32 %s2271_s28, 3 }
   0xf   : > { %s1926_s13 = scalar_lea.vmem %s2262_s0, %s1469_s10  ;;  %s2162_s9 = scalar_lea.vmem %s2269_s7, %s1469_s10 }
  0x10   : > { %v282_v4 = vld [vmem:[%s1926_s13] sm:$0xff]  ;;  %v283_v5 = vld [vmem:[%s1926_s13 + $0x8] sm:$0xff]  ;;  %v284_v6 = vld [vmem:[%s1926_s13 + $0x10] sm:$0xff] }
  0x11   : > { %1679 = vmatprep.mubr.msk.f32.mxu0 %vm322_vm1, %v282_v4  ;;  %v285_v7 = vld [vmem:[%s1926_s13 + $0x18] sm:$0xff]  ;;  %v286_v8 = vld [vmem:[%s1926_s13 + $0x20] sm:$0xff]  ;;  %v299_v10 = vld [vmem:[%s1926_s13 + $0x88] sm:$0xff] }
  0x12   : > { %1680 = vmatmul.mubr.msk.f32.vlgmr.msra.gmra.mrb[0].mxu0 %vm322_vm1, %v283_v5  ;;  %v298_v9 = vld [vmem:[%s1926_s13 + $0x80] sm:$0xff]  ;;  %v300_v11 = vld [vmem:[%s1926_s13 + $0x90] sm:$0xff]  ;;  %v287_v13 = vld [vmem:[%s1926_s13 + $0x28] sm:$0xff] }
  0x13   : > { %1682 = vmatprep.mubr.msk.f32.mxu0 %vm322_vm1, %v284_v6  ;;  %1703 = vmatprep.mubr.msk.f32.mxu1 %vm322_vm1, %v298_v9  ;;  %v288_v14 = vld [vmem:[%s1926_s13 + $0x30] sm:$0xff]  ;;  %v301_v15 = vld [vmem:[%s1926_s13 + $0x98] sm:$0xff]  ;;  %v302_v16 = vld [vmem:[%s1926_s13 + $0xa0] sm:$0xff] }
  0x14   : > { %1704 = vmatmul.mubr.msk.f32.vlgmr.msra.gmra.mrb[0].mxu1 %vm322_vm1, %v299_v10  ;;  %v289_v17 = vld [vmem:[%s1926_s13 + $0x38] sm:$0xff]  ;;  %v290_v18 = vld [vmem:[%s1926_s13 + $0x40] sm:$0xff]  ;;  %v303_v19 = vld [vmem:[%s1926_s13 + $0xa8] sm:$0xff]  ;;  %1842 = vmatpush3.bf16.msra.mxu0 %v1839_v39 }
  0x15   : > { %1706 = vmatprep.mubr.msk.f32.mxu1 %vm322_vm1, %v300_v11  ;;  %1838 = vmatpush3.bf16.msra.mxu1 %v1835_v3  ;;  %v304_v20 = vld [vmem:[%s1926_s13 + $0xb0] sm:$0xff]  ;;  %v291_v21 = vld [vmem:[%s1926_s13 + $0x48] sm:$0xff]  ;;  %v305_v23 = vld [vmem:[%s1926_s13 + $0xb8] sm:$0xff] }
  0x16   : > { %1683 = vmatmul.mubr.msk.f32.gmra.mrb[2].mxu0 %vm322_vm1, %v285_v7  ;;  %1731 = vmatprep.subr.mxu1 %v682_v12  ;;  %v292_v22 = vld [vmem:[%s1926_s13 + $0x50] sm:$0xff]  ;;  %v306_v24 = vld [vmem:[%s1926_s13 + $0xc0] sm:$0xff]  ;;  %v293_v25 = vld [vmem:[%s1926_s13 + $0x58] sm:$0xff] }
  0x17   : > { %1685 = vmatprep.mubr.msk.f32.mxu0 %vm322_vm1, %v286_v8  ;;  %v294_v26 = vld [vmem:[%s1926_s13 + $0x60] sm:$0xff]  ;;  %v307_v27 = vld [vmem:[%s1926_s13 + $0xc8] sm:$0xff]  ;;  %v308_v28 = vld [vmem:[%s1926_s13 + $0xd0] sm:$0xff]  ;;  %1785 = vmatprep.subr.mxu0 %v1014_v40 }
  0x18   : > { %1707 = vmatmul.mubr.msk.f32.gmra.mrb[2].mxu1 %vm322_vm1, %v301_v15  ;;  %v295_v29 = vld [vmem:[%s1926_s13 + $0x68] sm:$0xff]  ;;  %v296_v30 = vld [vmem:[%s1926_s13 + $0x70] sm:$0xff]  ;;  %v309_v31 = vld [vmem:[%s1926_s13 + $0xd8] sm:$0xff]  ;;  %1786 = vmatpush3.msra.mxu0 %v1014_v40 }
  0x19   : > { %1709 = vmatprep.mubr.msk.f32.mxu1 %vm322_vm1, %v302_v16  ;;  %1732 = vmatpush3.msra.mxu1 %v682_v12  ;;  %v310_v32 = vld [vmem:[%s1926_s13 + $0xe0] sm:$0xff]  ;;  %v297_v33 = vld [vmem:[%s1926_s13 + $0x78] sm:$0xff]  ;;  %v311_v34 = vld [vmem:[%s1926_s13 + $0xe8] sm:$0xff] }
  0x1a   : > { %1686 = vmatmul.mubr.msk.f32.gmra.mrb[4].mxu0 %vm322_vm1, %v287_v13  ;;  %v312_v35 = vld [vmem:[%s1926_s13 + $0xf0] sm:$0xff]  ;;  %v313_v36 = vld [vmem:[%s1926_s13 + $0xf8] sm:$0xff] }
  0x1b   : > { %1688 = vmatprep.mubr.msk.f32.mxu0 %vm322_vm1, %v288_v14 }
  0x1c   : > { %1710 = vmatmul.mubr.msk.f32.gmra.mrb[4].mxu1 %vm322_vm1, %v303_v19 }
  0x1d   : > { %1712 = vmatprep.mubr.msk.f32.mxu1 %vm322_vm1, %v304_v20 }
  0x1e   : > { %1689 = vmatmul.mubr.msk.f32.gmra.mrb[6].mxu0 %vm322_vm1, %v289_v17 }
  0x1f   : > { %1691 = vmatprep.mubr.msk.f32.mxu0 %vm322_vm1, %v290_v18 }
  0x20   : > { %1713 = vmatmul.mubr.msk.f32.gmra.mrb[6].mxu1 %vm322_vm1, %v305_v23 }
  0x21   : > { %1715 = vmatprep.mubr.msk.f32.mxu1 %vm322_vm1, %v306_v24 }
  0x22   : > { %1692 = vmatmul.mubr.msk.f32.gmra.mrb[8].mxu0 %vm322_vm1, %v291_v21 }
  0x23   : > { %1694 = vmatprep.mubr.msk.f32.mxu0 %vm322_vm1, %v292_v22 }
  0x24   : > { %1716 = vmatmul.mubr.msk.f32.gmra.mrb[8].mxu1 %vm322_vm1, %v307_v27 }
  0x25   : > { %1718 = vmatprep.mubr.msk.f32.mxu1 %vm322_vm1, %v308_v28 }
  0x26   : > { %1695 = vmatmul.mubr.msk.f32.gmra.mrb[10].mxu0 %vm322_vm1, %v293_v25 }
  0x27   : > { %1697 = vmatprep.mubr.msk.f32.mxu0 %vm322_vm1, %v294_v26 }
  0x28   : > { %1719 = vmatmul.mubr.msk.f32.gmra.mrb[10].mxu1 %vm322_vm1, %v309_v31 }
  0x29   : > { %1721 = vmatprep.mubr.msk.f32.mxu1 %vm322_vm1, %v310_v32 }
  0x2a   : > { %1698 = vmatmul.mubr.msk.f32.gmra.mrb[12].mxu0 %vm322_vm1, %v295_v29 }
  0x2b   : > { %1700 = vmatprep.mubr.msk.f32.mxu0 %vm322_vm1, %v296_v30 }
  0x2c   : > { %1722 = vmatmul.mubr.msk.f32.gmra.mrb[12].mxu1 %vm322_vm1, %v311_v34 }
  0x2d   : > { %1724 = vmatprep.mubr.msk.f32.mxu1 %vm322_vm1, %v312_v35 }
  0x2e   : > { %1701 = vmatmul.mubr.msk.f32.gmra.mrb[14].mxu0 %vm322_vm1, %v297_v33 }
  0x30   : > { %1725 = vmatmul.mubr.msk.f32.gmra.mrb[14].mxu1 %vm322_vm1, %v313_v36 }
  0xe5   : > { %v1681_v42 = vpop.f32.mrb[0].mxu0 }
  0xe6   : > { %v495_v43 = vadd.f32 %v1681_v42, %v2007_v41  ;;  %v489_v44 = vpop.f32.mrb[1].mxu0 }
  0xe7   : > { %v490_v45 = vadd.f32 %v2007_v41, %v489_v44  ;;  %v2012_v51 = vpop.f32.mrb[0].mxu1 }
  0xe8   : > { %v649_v48 = vmax.f32 %v495_v43, 0.0  ;;  %v569_v53 = vpop.f32.mrb[1].mxu1  ;;  %v575_v44 = vadd.f32 %v2012_v51, %v2007_v41 }
  0xe9   : > { %v648_v46 = vmax.f32 %v490_v45, 0.0  ;;  %v1684_v47 = vpop.f32.mrb[2].mxu0  ;;  %v570_v32 = vadd.f32 %v2007_v41, %v569_v53 }
  0xea   : > { %v505_v49 = vadd.f32 %v1684_v47, %v2007_v41  ;;  %v499_v50 = vpop.f32.mrb[3].mxu0 }
  0xeb   : > { %v500_v52 = vadd.f32 %v2007_v41, %v499_v50  ;;  %1733 = vmatprep.mubr.msk.f32.mxu1 %vm690_vm2, %v648_v46  ;;  %v2018_v59 = vpop.f32.mrb[2].mxu1  ;;  %v664_v40 = vmax.f32 %v570_v32, 0.0 }
  0xec   : > { %1734 = vmatmul.mubr.msk.f32.vlgmr.msra.gmra.mrb[16].mxu1 %vm690_vm2, %v649_v48  ;;  %v651_v56 = vmax.f32 %v505_v49, 0.0  ;;  %v579_v61 = vpop.f32.mrb[3].mxu1  ;;  %v665_v49 = vmax.f32 %v575_v44, 0.0  ;;  %v585_v50 = vadd.f32 %v2018_v59, %v2007_v41 }
  0xed   : > { %v650_v54 = vmax.f32 %v500_v52, 0.0  ;;  %v1687_v55 = vpop.f32.mrb[4].mxu0  ;;  %v580_v42 = vadd.f32 %v2007_v41, %v579_v61 }
  0xee   : > { %v515_v57 = vadd.f32 %v1687_v55, %v2007_v41  ;;  %v509_v58 = vpop.f32.mrb[5].mxu0  ;;  %v667_v53 = vmax.f32 %v585_v50, 0.0 }
  0xef   : > { %v510_v60 = vadd.f32 %v2007_v41, %v509_v58  ;;  %1736 = vmatprep.mubr.msk.f32.mxu1 %vm690_vm2, %v650_v54  ;;  %v2024_v3 = vpop.f32.mrb[4].mxu1  ;;  %v666_v47 = vmax.f32 %v580_v42, 0.0 }
  0xf0   : > { %1737 = vmatmul.mubr.msk.f32.gmra.mrb[18].mxu1 %vm690_vm2, %v651_v56  ;;  %v653_v0 = vmax.f32 %v515_v57, 0.0  ;;  %v589_v5 = vpop.f32.mrb[5].mxu1  ;;  %v595_v54 = vadd.f32 %v2024_v3, %v2007_v41 }
  0xf1   : > { %v652_v62 = vmax.f32 %v510_v60, 0.0  ;;  %v1690_v63 = vpop.f32.mrb[6].mxu0  ;;  %v590_v48 = vadd.f32 %v2007_v41, %v589_v5 }
  0xf2   : > { %v525_v1 = vadd.f32 %v1690_v63, %v2007_v41  ;;  %v519_v2 = vpop.f32.mrb[7].mxu0  ;;  %v669_v57 = vmax.f32 %v595_v54, 0.0 }
  0xf3   : > { %v520_v4 = vadd.f32 %v2007_v41, %v519_v2  ;;  %1739 = vmatprep.mubr.msk.f32.mxu1 %vm690_vm2, %v652_v62  ;;  %v1714_v11 = vpop.f32.mrb[6].mxu1  ;;  %v668_v52 = vmax.f32 %v590_v48, 0.0 }
  0xf4   : > { %1740 = vmatmul.mubr.msk.f32.gmra.mrb[20].mxu1 %vm690_vm2, %v653_v0  ;;  %v655_v8 = vmax.f32 %v525_v1, 0.0  ;;  %v599_v13 = vpop.f32.mrb[7].mxu1  ;;  %v605_v58 = vadd.f32 %v1714_v11, %v2007_v41  ;;  %v2085_v11 = vld [vmem:[%s2266_s4] ss:$0 sm:$0xff] }
  0xf5   : > { %v654_v6 = vmax.f32 %v520_v4, 0.0  ;;  %v1693_v7 = vpop.f32.mrb[8].mxu0  ;;  %v600_v51 = vadd.f32 %v2007_v41, %v599_v13 }
  0xf6   : > { %v535_v9 = vadd.f32 %v1693_v7, %v2007_v41  ;;  %v529_v10 = vpop.f32.mrb[9].mxu0  ;;  %v671_v61 = vmax.f32 %v605_v58, 0.0 }
  0xf7   : > { %v530_v12 = vadd.f32 %v2007_v41, %v529_v10  ;;  %1742 = vmatprep.mubr.msk.f32.mxu1 %vm690_vm2, %v654_v6  ;;  %v1717_v19 = vpop.f32.mrb[8].mxu1  ;;  %v670_v55 = vmax.f32 %v600_v51, 0.0 }
  0xf8   : > { %1743 = vmatmul.mubr.msk.f32.gmra.mrb[22].mxu1 %vm690_vm2, %v655_v8  ;;  %v657_v16 = vmax.f32 %v535_v9, 0.0  ;;  %v609_v21 = vpop.f32.mrb[9].mxu1  ;;  %v615_v62 = vadd.f32 %v1717_v19, %v2007_v41 }
  0xf9   : > { %v656_v14 = vmax.f32 %v530_v12, 0.0  ;;  %v1696_v15 = vpop.f32.mrb[10].mxu0  ;;  %v610_v56 = vadd.f32 %v2007_v41, %v609_v21 }
  0xfa   : > { %v545_v17 = vadd.f32 %v1696_v15, %v2007_v41  ;;  %v539_v18 = vpop.f32.mrb[11].mxu0  ;;  %v673_v1 = vmax.f32 %v615_v62, 0.0 }
  0xfb   : > { %v540_v20 = vadd.f32 %v2007_v41, %v539_v18  ;;  %1745 = vmatprep.mubr.msk.f32.mxu1 %vm690_vm2, %v656_v14  ;;  %v1720_v27 = vpop.f32.mrb[10].mxu1  ;;  %v672_v59 = vmax.f32 %v610_v56, 0.0 }
  0xfc   : > { %1746 = vmatmul.mubr.msk.f32.gmra.mrb[24].mxu1 %vm690_vm2, %v657_v16  ;;  %v659_v24 = vmax.f32 %v545_v17, 0.0  ;;  %v619_v29 = vpop.f32.mrb[11].mxu1  ;;  %v625_v2 = vadd.f32 %v1720_v27, %v2007_v41 }
  0xfd   : > { %v658_v22 = vmax.f32 %v540_v20, 0.0  ;;  %v1699_v23 = vpop.f32.mrb[12].mxu0  ;;  %v620_v60 = vadd.f32 %v2007_v41, %v619_v29 }
  0xfe   : > { %v555_v25 = vadd.f32 %v1699_v23, %v2007_v41  ;;  %v549_v26 = vpop.f32.mrb[13].mxu0  ;;  %v675_v5 = vmax.f32 %v625_v2, 0.0 }
  0xff   : > { %v550_v28 = vadd.f32 %v2007_v41, %v549_v26  ;;  %1748 = vmatprep.mubr.msk.f32.mxu1 %vm690_vm2, %v658_v22  ;;  %v1723_v36 = vpop.f32.mrb[12].mxu1  ;;  %v674_v63 = vmax.f32 %v620_v60, 0.0 }
 0x100   : > { %1749 = vmatmul.mubr.msk.f32.gmra.mrb[26].mxu1 %vm690_vm2, %v659_v24  ;;  %v661_v33 = vmax.f32 %v555_v25, 0.0  ;;  %v629_v38 = vpop.f32.mrb[13].mxu1  ;;  %v635_v6 = vadd.f32 %v1723_v36, %v2007_v41 }
 0x101   : > { %v660_v30 = vmax.f32 %v550_v28, 0.0  ;;  %v1702_v31 = vpop.f32.mrb[14].mxu0  ;;  %v630_v0 = vadd.f32 %v2007_v41, %v629_v38 }
 0x102   : > { %v565_v34 = vadd.f32 %v1702_v31, %v2007_v41  ;;  %v559_v35 = vpop.f32.mrb[15].mxu0  ;;  %v677_v8 = vmax.f32 %v635_v6, 0.0 }
 0x103   : > { %v560_v37 = vadd.f32 %v2007_v41, %v559_v35  ;;  %1751 = vmatprep.mubr.msk.f32.mxu1 %vm690_vm2, %v660_v30  ;;  %v1726_v45 = vpop.f32.mrb[14].mxu1  ;;  %v676_v3 = vmax.f32 %v630_v0, 0.0 }
 0x104   : > { %1752 = vmatmul.mubr.msk.f32.gmra.mrb[28].mxu1 %vm690_vm2, %v661_v33  ;;  %v663_v43 = vmax.f32 %v565_v34, 0.0  ;;  %v639_v46 = vpop.f32.mrb[15].mxu1  ;;  %v645_v9 = vadd.f32 %v1726_v45, %v2007_v41 }
 0x105   : > { %v662_v39 = vmax.f32 %v560_v37, 0.0  ;;  %v640_v4 = vadd.f32 %v2007_v41, %v639_v46 }
 0x106   : > { %v679_v10 = vmax.f32 %v645_v9, 0.0 }
 0x107   : > { %1754 = vmatprep.mubr.msk.f32.mxu1 %vm690_vm2, %v662_v39  ;;  %v678_v7 = vmax.f32 %v640_v4, 0.0 }
 0x108   : > { %1755 = vmatmul.mubr.msk.f32.gmra.mrb[30].mxu1 %vm690_vm2, %v663_v43 }
 0x109   : > { %1757 = vmatprep.mubr.msk.f32.mxu1 %vm690_vm2, %v664_v40 }
 0x10c   : > { %1758 = vmatmul.mubr.msk.f32.gmra.mrb[32].mxu1 %vm690_vm2, %v665_v49 }
 0x10d   : > { %1760 = vmatprep.mubr.msk.f32.mxu1 %vm690_vm2, %v666_v47 }
 0x110   : > { %1761 = vmatmul.mubr.msk.f32.gmra.mrb[34].mxu1 %vm690_vm2, %v667_v53 }
 0x111   : > { %1763 = vmatprep.mubr.msk.f32.mxu1 %vm690_vm2, %v668_v52 }
 0x114   : > { %1764 = vmatmul.mubr.msk.f32.gmra.mrb[36].mxu1 %vm690_vm2, %v669_v57 }
 0x115   : > { %1766 = vmatprep.mubr.msk.f32.mxu1 %vm690_vm2, %v670_v55 }
 0x118   : > { %1767 = vmatmul.mubr.msk.f32.gmra.mrb[38].mxu1 %vm690_vm2, %v671_v61 }
 0x119   : > { %1769 = vmatprep.mubr.msk.f32.mxu1 %vm690_vm2, %v672_v59 }
 0x11c   : > { %1770 = vmatmul.mubr.msk.f32.gmra.mrb[40].mxu1 %vm690_vm2, %v673_v1 }
 0x11d   : > { %1772 = vmatprep.mubr.msk.f32.mxu1 %vm690_vm2, %v674_v63 }
 0x120   : > { %1773 = vmatmul.mubr.msk.f32.gmra.mrb[42].mxu1 %vm690_vm2, %v675_v5 }
 0x121   : > { %1775 = vmatprep.mubr.msk.f32.mxu1 %vm690_vm2, %v676_v3 }
 0x124   : > { %1776 = vmatmul.mubr.msk.f32.gmra.mrb[44].mxu1 %vm690_vm2, %v677_v8 }
 0x125   : > { %1778 = vmatprep.mubr.msk.f32.mxu1 %vm690_vm2, %v678_v7 }
 0x128   : > { %1779 = vmatmul.mubr.msk.f32.gmra.mrb[46].mxu1 %vm690_vm2, %v679_v10 }
 0x1bf   : > { %v1735_v12 = vpop.f32.mrb[16].mxu1 }
 0x1c0   : > { %v853_v13 = vpop.f32.mrb[17].mxu1  ;;  %v859_v15 = vadd.f32 %v1735_v12, %v2085_v11 }
 0x1c1   : > { %v854_v14 = vadd.f32 %v2085_v11, %v853_v13  ;;  %v2154_v13 = vld [vmem:[%s2268_s6] ss:$0 sm:$0xff] }
 0x1c3   : > { %v1738_v16 = vpop.f32.mrb[18].mxu1  ;;  %1787 = vmatprep.mubr.msk.f32.mxu0 %vm690_vm2, %v854_v14 }
 0x1c4   : > { %v863_v41 = vpop.f32.mrb[19].mxu1  ;;  %1788 = vmatmul.mubr.msk.f32.vlgmr.msra.gmra.mrb[16].mxu0 %vm690_vm2, %v859_v15  ;;  %v869_v18 = vadd.f32 %v1738_v16, %v2085_v11 }
 0x1c5   : > { %v864_v17 = vadd.f32 %v2085_v11, %v863_v41 }
 0x1c7   : > { %v1741_v19 = vpop.f32.mrb[20].mxu1  ;;  %1790 = vmatprep.mubr.msk.f32.mxu0 %vm690_vm2, %v864_v17 }
 0x1c8   : > { %v873_v20 = vpop.f32.mrb[21].mxu1  ;;  %1791 = vmatmul.mubr.msk.f32.gmra.mrb[18].mxu0 %vm690_vm2, %v869_v18  ;;  %v879_v22 = vadd.f32 %v1741_v19, %v2085_v11 }
 0x1c9   : > { %v874_v21 = vadd.f32 %v2085_v11, %v873_v20 }
 0x1cb   : > { %v1744_v23 = vpop.f32.mrb[22].mxu1  ;;  %1793 = vmatprep.mubr.msk.f32.mxu0 %vm690_vm2, %v874_v21 }
 0x1cc   : > { %v883_v24 = vpop.f32.mrb[23].mxu1  ;;  %1794 = vmatmul.mubr.msk.f32.gmra.mrb[20].mxu0 %vm690_vm2, %v879_v22  ;;  %v889_v26 = vadd.f32 %v1744_v23, %v2085_v11 }
 0x1cd   : > { %v884_v25 = vadd.f32 %v2085_v11, %v883_v24 }
 0x1cf   : > { %v1747_v27 = vpop.f32.mrb[24].mxu1  ;;  %1796 = vmatprep.mubr.msk.f32.mxu0 %vm690_vm2, %v884_v25 }
 0x1d0   : > { %v893_v28 = vpop.f32.mrb[25].mxu1  ;;  %1797 = vmatmul.mubr.msk.f32.gmra.mrb[22].mxu0 %vm690_vm2, %v889_v26  ;;  %v899_v30 = vadd.f32 %v1747_v27, %v2085_v11 }
 0x1d1   : > { %v894_v29 = vadd.f32 %v2085_v11, %v893_v28 }
 0x1d3   : > { %v1750_v31 = vpop.f32.mrb[26].mxu1  ;;  %1799 = vmatprep.mubr.msk.f32.mxu0 %vm690_vm2, %v894_v29 }
 0x1d4   : > { %v903_v32 = vpop.f32.mrb[27].mxu1  ;;  %1800 = vmatmul.mubr.msk.f32.gmra.mrb[24].mxu0 %vm690_vm2, %v899_v30  ;;  %v909_v34 = vadd.f32 %v1750_v31, %v2085_v11 }
 0x1d5   : > { %v904_v33 = vadd.f32 %v2085_v11, %v903_v32 }
 0x1d7   : > { %v1753_v35 = vpop.f32.mrb[28].mxu1  ;;  %1802 = vmatprep.mubr.msk.f32.mxu0 %vm690_vm2, %v904_v33 }
 0x1d8   : > { %v913_v36 = vpop.f32.mrb[29].mxu1  ;;  %1803 = vmatmul.mubr.msk.f32.gmra.mrb[26].mxu0 %vm690_vm2, %v909_v34  ;;  %v919_v38 = vadd.f32 %v1753_v35, %v2085_v11 }
 0x1d9   : > { %v914_v37 = vadd.f32 %v2085_v11, %v913_v36 }
 0x1db   : > { %v1756_v39 = vpop.f32.mrb[30].mxu1  ;;  %1805 = vmatprep.mubr.msk.f32.mxu0 %vm690_vm2, %v914_v37 }
 0x1dc   : > { %v923_v40 = vpop.f32.mrb[31].mxu1  ;;  %1806 = vmatmul.mubr.msk.f32.gmra.mrb[28].mxu0 %vm690_vm2, %v919_v38  ;;  %v929_v43 = vadd.f32 %v1756_v39, %v2085_v11 }
 0x1dd   : > { %v924_v42 = vadd.f32 %v2085_v11, %v923_v40 }
 0x1df   : > { %v1759_v44 = vpop.f32.mrb[32].mxu1  ;;  %1808 = vmatprep.mubr.msk.f32.mxu0 %vm690_vm2, %v924_v42 }
 0x1e0   : > { %v933_v45 = vpop.f32.mrb[33].mxu1  ;;  %1809 = vmatmul.mubr.msk.f32.gmra.mrb[30].mxu0 %vm690_vm2, %v929_v43  ;;  %v939_v47 = vadd.f32 %v1759_v44, %v2085_v11 }
 0x1e1   : > { %v934_v46 = vadd.f32 %v2085_v11, %v933_v45 }
 0x1e3   : > { %v1762_v48 = vpop.f32.mrb[34].mxu1  ;;  %1811 = vmatprep.mubr.msk.f32.mxu0 %vm690_vm2, %v934_v46 }
 0x1e4   : > { %v943_v49 = vpop.f32.mrb[35].mxu1  ;;  %1812 = vmatmul.mubr.msk.f32.gmra.mrb[32].mxu0 %vm690_vm2, %v939_v47  ;;  %v949_v52 = vadd.f32 %v1762_v48, %v2085_v11 }
 0x1e5   : > { %v944_v50 = vadd.f32 %v2085_v11, %v943_v49 }
 0x1e7   : > { %v1765_v51 = vpop.f32.mrb[36].mxu1  ;;  %1814 = vmatprep.mubr.msk.f32.mxu0 %vm690_vm2, %v944_v50 }
 0x1e8   : > { %v953_v53 = vpop.f32.mrb[37].mxu1  ;;  %1815 = vmatmul.mubr.msk.f32.gmra.mrb[34].mxu0 %vm690_vm2, %v949_v52  ;;  %v959_v55 = vadd.f32 %v1765_v51, %v2085_v11 }
 0x1e9   : > { %v954_v54 = vadd.f32 %v2085_v11, %v953_v53 }
 0x1eb   : > { %v1768_v56 = vpop.f32.mrb[38].mxu1  ;;  %1817 = vmatprep.mubr.msk.f32.mxu0 %vm690_vm2, %v954_v54 }
 0x1ec   : > { %v963_v57 = vpop.f32.mrb[39].mxu1  ;;  %1818 = vmatmul.mubr.msk.f32.gmra.mrb[36].mxu0 %vm690_vm2, %v959_v55  ;;  %v969_v59 = vadd.f32 %v1768_v56, %v2085_v11 }
 0x1ed   : > { %v964_v58 = vadd.f32 %v2085_v11, %v963_v57 }
 0x1ef   : > { %v1771_v60 = vpop.f32.mrb[40].mxu1  ;;  %1820 = vmatprep.mubr.msk.f32.mxu0 %vm690_vm2, %v964_v58 }
 0x1f0   : > { %v973_v61 = vpop.f32.mrb[41].mxu1  ;;  %1821 = vmatmul.mubr.msk.f32.gmra.mrb[38].mxu0 %vm690_vm2, %v969_v59  ;;  %v979_v63 = vadd.f32 %v1771_v60, %v2085_v11 }
 0x1f1   : > { %v974_v62 = vadd.f32 %v2085_v11, %v973_v61 }
 0x1f3   : > { %v1774_v0 = vpop.f32.mrb[42].mxu1  ;;  %1823 = vmatprep.mubr.msk.f32.mxu0 %vm690_vm2, %v974_v62 }
 0x1f4   : > { %v983_v1 = vpop.f32.mrb[43].mxu1  ;;  %1824 = vmatmul.mubr.msk.f32.gmra.mrb[40].mxu0 %vm690_vm2, %v979_v63  ;;  %v989_v3 = vadd.f32 %v1774_v0, %v2085_v11 }
 0x1f5   : > { %v984_v2 = vadd.f32 %v2085_v11, %v983_v1 }
 0x1f7   : > { %v1777_v4 = vpop.f32.mrb[44].mxu1  ;;  %1826 = vmatprep.mubr.msk.f32.mxu0 %vm690_vm2, %v984_v2 }
 0x1f8   : > { %v993_v5 = vpop.f32.mrb[45].mxu1  ;;  %1827 = vmatmul.mubr.msk.f32.gmra.mrb[42].mxu0 %vm690_vm2, %v989_v3  ;;  %v999_v7 = vadd.f32 %v1777_v4, %v2085_v11 }
 0x1f9   : > { %v994_v6 = vadd.f32 %v2085_v11, %v993_v5 }
 0x1fb   : > { %v1780_v8 = vpop.f32.mrb[46].mxu1  ;;  %1829 = vmatprep.mubr.msk.f32.mxu0 %vm690_vm2, %v994_v6 }
 0x1fc   : > { %v1003_v9 = vpop.f32.mrb[47].mxu1  ;;  %1830 = vmatmul.mubr.msk.f32.gmra.mrb[44].mxu0 %vm690_vm2, %v999_v7  ;;  %v1009_v12 = vadd.f32 %v1780_v8, %v2085_v11 }
 0x1fd   : > { %v1004_v10 = vadd.f32 %v2085_v11, %v1003_v9 }
 0x1ff   : > { %1832 = vmatprep.mubr.msk.f32.mxu0 %vm690_vm2, %v1004_v10 }
 0x200   : > { %1833 = vmatmul.mubr.msk.f32.gmra.mrb[46].mxu0 %vm690_vm2, %v1009_v12 }
 0x297   : > { %v1789_v14 = vpop.f32.mrb[16].mxu0 }
 0x298   : > { %v1190_v15 = vadd.f32 %v1789_v14, %v2154_v13  ;;  %v1184_v16 = vpop.f32.mrb[17].mxu0 }
 0x299   : > { %v1185_v11 = vadd.f32 %v2154_v13, %v1184_v16 }
 0x29a   : > { %v1344_v41 = vmax.f32 %v1190_v15, 0.0 }
 0x29b   : > { %v1343_v17 = vmax.f32 %v1185_v11, 0.0  ;;  %v1792_v18 = vpop.f32.mrb[18].mxu0 }
 0x29c   : > { %1376 = vst.msk [vmem:[%s2162_s9 + $0x8] sm:$0xff] %vm690_vm2, %v1344_v41  ;;  %v1200_v19 = vadd.f32 %v1792_v18, %v2154_v13  ;;  %v1194_v20 = vpop.f32.mrb[19].mxu0 }
 0x29d   : > { %1375 = vst.msk [vmem:[%s2162_s9] sm:$0xff] %vm690_vm2, %v1343_v17  ;;  %v1195_v21 = vadd.f32 %v2154_v13, %v1194_v20 }
 0x29e   : > { %v1346_v22 = vmax.f32 %v1200_v19, 0.0 }
 0x29f   : > { %v1345_v23 = vmax.f32 %v1195_v21, 0.0  ;;  %v1795_v24 = vpop.f32.mrb[20].mxu0 }
 0x2a0   : > { %1378 = vst.msk [vmem:[%s2162_s9 + $0x18] sm:$0xff] %vm690_vm2, %v1346_v22  ;;  %v1210_v25 = vadd.f32 %v1795_v24, %v2154_v13  ;;  %v1204_v26 = vpop.f32.mrb[21].mxu0 }
 0x2a1   : > { %1377 = vst.msk [vmem:[%s2162_s9 + $0x10] sm:$0xff] %vm690_vm2, %v1345_v23  ;;  %v1205_v27 = vadd.f32 %v2154_v13, %v1204_v26 }
 0x2a2   : > { %v1348_v28 = vmax.f32 %v1210_v25, 0.0 }
 0x2a3   : > { %v1347_v29 = vmax.f32 %v1205_v27, 0.0  ;;  %v1798_v30 = vpop.f32.mrb[22].mxu0 }
 0x2a4   : > { %1380 = vst.msk [vmem:[%s2162_s9 + $0x28] sm:$0xff] %vm690_vm2, %v1348_v28  ;;  %v1220_v31 = vadd.f32 %v1798_v30, %v2154_v13  ;;  %v1214_v32 = vpop.f32.mrb[23].mxu0 }
 0x2a5   : > { %1379 = vst.msk [vmem:[%s2162_s9 + $0x20] sm:$0xff] %vm690_vm2, %v1347_v29  ;;  %v1215_v33 = vadd.f32 %v2154_v13, %v1214_v32 }
 0x2a6   : > { %v1350_v34 = vmax.f32 %v1220_v31, 0.0 }
 0x2a7   : > { %v1349_v35 = vmax.f32 %v1215_v33, 0.0  ;;  %v1801_v36 = vpop.f32.mrb[24].mxu0 }
 0x2a8   : > { %1382 = vst.msk [vmem:[%s2162_s9 + $0x38] sm:$0xff] %vm690_vm2, %v1350_v34  ;;  %v1230_v37 = vadd.f32 %v1801_v36, %v2154_v13  ;;  %v1224_v38 = vpop.f32.mrb[25].mxu0 }
 0x2a9   : > { %1381 = vst.msk [vmem:[%s2162_s9 + $0x30] sm:$0xff] %vm690_vm2, %v1349_v35  ;;  %v1225_v39 = vadd.f32 %v2154_v13, %v1224_v38 }
 0x2aa   : > { %v1352_v40 = vmax.f32 %v1230_v37, 0.0 }
 0x2ab   : > { %v1351_v42 = vmax.f32 %v1225_v39, 0.0  ;;  %v1804_v43 = vpop.f32.mrb[26].mxu0 }
 0x2ac   : > { %1384 = vst.msk [vmem:[%s2162_s9 + $0x48] sm:$0xff] %vm690_vm2, %v1352_v40  ;;  %v1240_v44 = vadd.f32 %v1804_v43, %v2154_v13  ;;  %v1234_v45 = vpop.f32.mrb[27].mxu0 }
 0x2ad   : > { %1383 = vst.msk [vmem:[%s2162_s9 + $0x40] sm:$0xff] %vm690_vm2, %v1351_v42  ;;  %v1235_v46 = vadd.f32 %v2154_v13, %v1234_v45 }
 0x2ae   : > { %v1354_v47 = vmax.f32 %v1240_v44, 0.0 }
 0x2af   : > { %v1353_v48 = vmax.f32 %v1235_v46, 0.0  ;;  %v1807_v49 = vpop.f32.mrb[28].mxu0 }
 0x2b0   : > { %1386 = vst.msk [vmem:[%s2162_s9 + $0x58] sm:$0xff] %vm690_vm2, %v1354_v47  ;;  %v1250_v50 = vadd.f32 %v1807_v49, %v2154_v13  ;;  %v1244_v52 = vpop.f32.mrb[29].mxu0 }
 0x2b1   : > { %1385 = vst.msk [vmem:[%s2162_s9 + $0x50] sm:$0xff] %vm690_vm2, %v1353_v48  ;;  %v1245_v51 = vadd.f32 %v2154_v13, %v1244_v52 }
 0x2b2   : > { %v1356_v53 = vmax.f32 %v1250_v50, 0.0 }
 0x2b3   : > { %v1355_v54 = vmax.f32 %v1245_v51, 0.0  ;;  %v1810_v55 = vpop.f32.mrb[30].mxu0 }
 0x2b4   : > { %1388 = vst.msk [vmem:[%s2162_s9 + $0x68] sm:$0xff] %vm690_vm2, %v1356_v53  ;;  %v1260_v56 = vadd.f32 %v1810_v55, %v2154_v13  ;;  %v1254_v57 = vpop.f32.mrb[31].mxu0 }
 0x2b5   : > { %1387 = vst.msk [vmem:[%s2162_s9 + $0x60] sm:$0xff] %vm690_vm2, %v1355_v54  ;;  %v1255_v58 = vadd.f32 %v2154_v13, %v1254_v57 }
 0x2b6   : > { %v1358_v59 = vmax.f32 %v1260_v56, 0.0 }
 0x2b7   : > { %v1357_v60 = vmax.f32 %v1255_v58, 0.0  ;;  %v1813_v61 = vpop.f32.mrb[32].mxu0 }
 0x2b8   : > { %1390 = vst.msk [vmem:[%s2162_s9 + $0x78] sm:$0xff] %vm690_vm2, %v1358_v59  ;;  %v1270_v62 = vadd.f32 %v1813_v61, %v2154_v13  ;;  %v1264_v63 = vpop.f32.mrb[33].mxu0 }
 0x2b9   : > { %1389 = vst.msk [vmem:[%s2162_s9 + $0x70] sm:$0xff] %vm690_vm2, %v1357_v60  ;;  %v1265_v0 = vadd.f32 %v2154_v13, %v1264_v63 }
 0x2ba   : > { %v1360_v1 = vmax.f32 %v1270_v62, 0.0 }
 0x2bb   : > { %v1359_v2 = vmax.f32 %v1265_v0, 0.0  ;;  %v1816_v3 = vpop.f32.mrb[34].mxu0 }
 0x2bc   : > { %1392 = vst.msk [vmem:[%s2162_s9 + $0x88] sm:$0xff] %vm690_vm2, %v1360_v1  ;;  %v1280_v4 = vadd.f32 %v1816_v3, %v2154_v13  ;;  %v1274_v5 = vpop.f32.mrb[35].mxu0 }
 0x2bd   : > { %1391 = vst.msk [vmem:[%s2162_s9 + $0x80] sm:$0xff] %vm690_vm2, %v1359_v2  ;;  %v1275_v6 = vadd.f32 %v2154_v13, %v1274_v5 }
 0x2be   : > { %v1362_v7 = vmax.f32 %v1280_v4, 0.0 }
 0x2bf   : > { %v1361_v8 = vmax.f32 %v1275_v6, 0.0  ;;  %v1819_v9 = vpop.f32.mrb[36].mxu0 }
 0x2c0   : > { %1394 = vst.msk [vmem:[%s2162_s9 + $0x98] sm:$0xff] %vm690_vm2, %v1362_v7  ;;  %v1290_v10 = vadd.f32 %v1819_v9, %v2154_v13  ;;  %v1284_v12 = vpop.f32.mrb[37].mxu0 }
 0x2c1   : > { %1393 = vst.msk [vmem:[%s2162_s9 + $0x90] sm:$0xff] %vm690_vm2, %v1361_v8  ;;  %v1285_v14 = vadd.f32 %v2154_v13, %v1284_v12 }
 0x2c2   : > { %v1364_v15 = vmax.f32 %v1290_v10, 0.0 }
 0x2c3   : > { %v1363_v16 = vmax.f32 %v1285_v14, 0.0  ;;  %v1822_v11 = vpop.f32.mrb[38].mxu0 }
 0x2c4   : > { %1396 = vst.msk [vmem:[%s2162_s9 + $0xa8] sm:$0xff] %vm690_vm2, %v1364_v15  ;;  %v1300_v41 = vadd.f32 %v1822_v11, %v2154_v13  ;;  %v1294_v17 = vpop.f32.mrb[39].mxu0 }
 0x2c5   : > { %1395 = vst.msk [vmem:[%s2162_s9 + $0xa0] sm:$0xff] %vm690_vm2, %v1363_v16  ;;  %v1295_v18 = vadd.f32 %v2154_v13, %v1294_v17 }
 0x2c6   : > { %v1366_v19 = vmax.f32 %v1300_v41, 0.0 }
 0x2c7   : > { %v1365_v20 = vmax.f32 %v1295_v18, 0.0  ;;  %v1825_v21 = vpop.f32.mrb[40].mxu0 }
 0x2c8   : > { %1398 = vst.msk [vmem:[%s2162_s9 + $0xb8] sm:$0xff] %vm690_vm2, %v1366_v19  ;;  %v1310_v22 = vadd.f32 %v1825_v21, %v2154_v13  ;;  %v1304_v23 = vpop.f32.mrb[41].mxu0 }
 0x2c9   : > { %1397 = vst.msk [vmem:[%s2162_s9 + $0xb0] sm:$0xff] %vm690_vm2, %v1365_v20  ;;  %v1305_v24 = vadd.f32 %v2154_v13, %v1304_v23 }
 0x2ca   : > { %v1368_v25 = vmax.f32 %v1310_v22, 0.0 }
 0x2cb   : > { %v1367_v26 = vmax.f32 %v1305_v24, 0.0  ;;  %v1828_v27 = vpop.f32.mrb[42].mxu0 }
 0x2cc   : > { %1400 = vst.msk [vmem:[%s2162_s9 + $0xc8] sm:$0xff] %vm690_vm2, %v1368_v25  ;;  %v1320_v28 = vadd.f32 %v1828_v27, %v2154_v13  ;;  %v1314_v29 = vpop.f32.mrb[43].mxu0 }
 0x2cd   : > { %1399 = vst.msk [vmem:[%s2162_s9 + $0xc0] sm:$0xff] %vm690_vm2, %v1367_v26  ;;  %v1315_v30 = vadd.f32 %v2154_v13, %v1314_v29 }
 0x2ce   : > { %v1370_v31 = vmax.f32 %v1320_v28, 0.0 }
 0x2cf   : > { %v1369_v32 = vmax.f32 %v1315_v30, 0.0  ;;  %v1831_v33 = vpop.f32.mrb[44].mxu0 }
 0x2d0   : > { %1402 = vst.msk [vmem:[%s2162_s9 + $0xd8] sm:$0xff] %vm690_vm2, %v1370_v31  ;;  %v1330_v34 = vadd.f32 %v1831_v33, %v2154_v13  ;;  %v1324_v35 = vpop.f32.mrb[45].mxu0 }
 0x2d1   : > { %1401 = vst.msk [vmem:[%s2162_s9 + $0xd0] sm:$0xff] %vm690_vm2, %v1369_v32  ;;  %v1325_v36 = vadd.f32 %v2154_v13, %v1324_v35 }
 0x2d2   : > { %v1372_v37 = vmax.f32 %v1330_v34, 0.0 }
 0x2d3   : > { %v1371_v38 = vmax.f32 %v1325_v36, 0.0  ;;  %v1834_v39 = vpop.f32.mrb[46].mxu0 }
 0x2d4   : > { %1404 = vst.msk [vmem:[%s2162_s9 + $0xe8] sm:$0xff] %vm690_vm2, %v1372_v37  ;;  %v1340_v40 = vadd.f32 %v1834_v39, %v2154_v13  ;;  %v1334_v42 = vpop.f32.mrb[47].mxu0 }
 0x2d5   : > { %1403 = vst.msk [vmem:[%s2162_s9 + $0xe0] sm:$0xff] %vm690_vm2, %v1371_v38  ;;  %v1335_v43 = vadd.f32 %v2154_v13, %v1334_v42 }
 0x2d6   : > { %v1374_v44 = vmax.f32 %v1340_v40, 0.0 }
 0x2d7   : > { %v1373_v45 = vmax.f32 %v1335_v43, 0.0 }
 0x2d8   : > { %1406 = vst.msk [vmem:[%s2162_s9 + $0xf8] sm:$0xff] %vm690_vm2, %v1374_v44 }
 0x2d9   : > { %1405 = vst.msk [vmem:[%s2162_s9 + $0xf0] sm:$0xff] %vm690_vm2, %v1373_v45 }
 0x2da PF: > { %s17_s24 = sadd.s32 1, %s1859_s24  }
 0x2db   : > { %p14_p4 = scmp.ge.s32.totalorder %s17_s24, 4  }
 0x2dd   :  { %16 = sbr.rel (!%p14_p4) target bundleno = 1 (0x1), region = 78 }

</bundles_post_ra>
